<compile_context>
chip_gen: v5e
topology: v5e:2x2
jax: 0.10.0
libtpu: 0.0.40
codegen_flags: <defaults>
</compile_context>

<pallas_src>
import jax
import jax.numpy as jnp
from jax.experimental import pallas as pl
from jax.experimental.pallas import tpu as pltpu


# ----------------------------------------------------------------------------
# Primary path: true identity, no kernel boundary.
# ----------------------------------------------------------------------------
def identity(x: jax.Array) -> jax.Array:
    """Identity forward pass — cheapest possible: just return the input."""
    return x


# ----------------------------------------------------------------------------
# Materialized identity: single-pass HBM->HBM DMA (no VMEM staging).
# ----------------------------------------------------------------------------
_MAX_OUTSTANDING_DMAS = 4  # >=2 outstanding DMAs helps v7x; neutral on v5e/v6e.


def _make_dma_copy_kernel(chunks):
    """Kernel that copies x -> o with len(chunks) outstanding HBM->HBM DMAs.

    `chunks` is a static tuple of (start, size) splits over the leading dim,
    computed at trace time, so every slice below is static.
    """

    def kernel(x_hbm, o_hbm, sems):
        copies = []
        for i, (start, size) in enumerate(chunks):
            cp = pltpu.make_async_copy(
                x_hbm.at[pl.ds(start, size)],
                o_hbm.at[pl.ds(start, size)],
                sems.at[i],
            )
            cp.start()
            copies.append(cp)
        for cp in copies:
            cp.wait()

    return kernel


def identity_copy(x: jax.Array) -> jax.Array:
    """Identity that materializes a fresh buffer via direct HBM->HBM DMA."""
    if x.size == 0:
        # grid/DMA of zero elements is ill-formed; an empty array is already
        # a correct identity result.
        return x

    orig_shape = x.shape
    x_nd = x if x.ndim >= 1 else x.reshape(1)
    n0 = x_nd.shape[0]

    # Static chunking over the leading dim -> a few outstanding DMAs.
    num_chunks = max(1, min(_MAX_OUTSTANDING_DMAS, n0))
    base, rem = divmod(n0, num_chunks)
    chunks = []
    start = 0
    for i in range(num_chunks):
        size = base + (1 if i < rem else 0)
        chunks.append((start, size))
        start += size

    out = pl.pallas_call(
        _make_dma_copy_kernel(tuple(chunks)),
        out_shape=jax.ShapeDtypeStruct(x_nd.shape, x_nd.dtype),
        in_specs=[pl.BlockSpec(memory_space=pl.ANY)],   # raw HBM ref
        out_specs=pl.BlockSpec(memory_space=pl.ANY),    # raw HBM ref
        scratch_shapes=[pltpu.SemaphoreType.DMA((num_chunks,))],
        cost_estimate=pl.CostEstimate(
            flops=0,
            transcendentals=0,
            bytes_accessed=2 * x.size * x.dtype.itemsize,
        ),
    )(x_nd)

    return out.reshape(orig_shape)


# ----------------------------------------------------------------------------
# Optional: aliased (zero-HBM-traffic) identity. Only truly free under jit
# buffer donation (donate_argnums); otherwise XLA adds one copy outside.
# ----------------------------------------------------------------------------
def _alias_kernel(x_hbm_ref, o_hbm_ref):
    # Output buffer *is* the input buffer (input_output_aliases={0: 0});
    # nothing to read or write.
    del x_hbm_ref, o_hbm_ref


def identity_aliased(x: jax.Array) -> jax.Array:
    return pl.pallas_call(
        _alias_kernel,
        out_shape=jax.ShapeDtypeStruct(x.shape, x.dtype),
        in_specs=[pl.BlockSpec(memory_space=pl.ANY)],
        out_specs=pl.BlockSpec(memory_space=pl.ANY),
        input_output_aliases={0: 0},
    )(x)


if __name__ == "__main__":
    key = jax.random.PRNGKey(0)
    batch, d = 8, 32  # Identity(d=32), small batch
    x = jax.random.normal(key, (batch, d), dtype=jnp.float32)

    # Primary path: plain return (what the PyTorch module does).
    y = identity(x)
    jax.block_until_ready(y)
    assert y.shape == x.shape and y.dtype == x.dtype
    assert bool(jnp.all(y == x))

    # Pallas kernel path: direct HBM->HBM DMA copy.
    y2 = identity_copy(x)
    jax.block_until_ready(y2)
    assert y2.shape == x.shape and y2.dtype == x.dtype
    assert bool(jnp.all(y2 == x))

    # Aliased kernel path (zero-traffic only under donation).
    y3 = identity_aliased(x)
    jax.block_until_ready(y3)
    assert y3.shape == x.shape and y3.dtype == x.dtype
    assert bool(jnp.all(y3 == x))

    print("KERNEL_OK")
</pallas_src>

<mosaic_0001>
module attributes {stable_mosaic.version = 11 : i64} {
  func.func @kernel(%arg0: memref<8x32xf32, #tpu.memory_space<any>>, %arg1: memref<8x32xf32, #tpu.memory_space<any>>, %arg2: memref<4x!tpu.dma_semaphore, #tpu.memory_space<semaphore_mem>>) attributes {dimension_semantics = [], scalar_prefetch = 0 : i64, scratch_operands = 1 : i64, tpu.core_type = #tpu.core_type<tc>} {
    %c0_i32 = arith.constant 0 : i32
    %c0_i32_0 = arith.constant 0 : i32
    %c0_i32_1 = arith.constant 0 : i32
    %0 = tpu.memref_slice %arg0[%c0_i32_0, %c0_i32_1] : memref<8x32xf32, #tpu.memory_space<any>> -> memref<2x32xf32, #tpu.memory_space<any>>
    %c0_i32_2 = arith.constant 0 : i32
    %c0_i32_3 = arith.constant 0 : i32
    %1 = tpu.memref_slice %arg1[%c0_i32_2, %c0_i32_3] : memref<8x32xf32, #tpu.memory_space<any>> -> memref<2x32xf32, #tpu.memory_space<any>>
    %2 = tpu.memref_slice %arg2[%c0_i32] : memref<4x!tpu.dma_semaphore, #tpu.memory_space<semaphore_mem>> -> memref<1x!tpu.dma_semaphore, #tpu.memory_space<semaphore_mem>>
    %3 = tpu.memref_squeeze %2 : memref<1x!tpu.dma_semaphore, #tpu.memory_space<semaphore_mem>> -> memref<!tpu.dma_semaphore, #tpu.memory_space<semaphore_mem>>
    tpu.enqueue_dma source(%0 : memref<2x32xf32, #tpu.memory_space<any>>) target(%1 : memref<2x32xf32, #tpu.memory_space<any>>) target_semaphore(%3 : memref<!tpu.dma_semaphore, #tpu.memory_space<semaphore_mem>>)
    %c1_i32 = arith.constant 1 : i32
    %c2_i32 = arith.constant 2 : i32
    %c0_i32_4 = arith.constant 0 : i32
    %4 = tpu.memref_slice %arg0[%c2_i32, %c0_i32_4] : memref<8x32xf32, #tpu.memory_space<any>> -> memref<2x32xf32, #tpu.memory_space<any>>
    %c2_i32_5 = arith.constant 2 : i32
    %c0_i32_6 = arith.constant 0 : i32
    %5 = tpu.memref_slice %arg1[%c2_i32_5, %c0_i32_6] : memref<8x32xf32, #tpu.memory_space<any>> -> memref<2x32xf32, #tpu.memory_space<any>>
    %6 = tpu.memref_slice %arg2[%c1_i32] : memref<4x!tpu.dma_semaphore, #tpu.memory_space<semaphore_mem>> -> memref<1x!tpu.dma_semaphore, #tpu.memory_space<semaphore_mem>>
    %7 = tpu.memref_squeeze %6 : memref<1x!tpu.dma_semaphore, #tpu.memory_space<semaphore_mem>> -> memref<!tpu.dma_semaphore, #tpu.memory_space<semaphore_mem>>
    tpu.enqueue_dma source(%4 : memref<2x32xf32, #tpu.memory_space<any>>) target(%5 : memref<2x32xf32, #tpu.memory_space<any>>) target_semaphore(%7 : memref<!tpu.dma_semaphore, #tpu.memory_space<semaphore_mem>>)
    %c2_i32_7 = arith.constant 2 : i32
    %c4_i32 = arith.constant 4 : i32
    %c0_i32_8 = arith.constant 0 : i32
    %8 = tpu.memref_slice %arg0[%c4_i32, %c0_i32_8] : memref<8x32xf32, #tpu.memory_space<any>> -> memref<2x32xf32, #tpu.memory_space<any>>
    %c4_i32_9 = arith.constant 4 : i32
    %c0_i32_10 = arith.constant 0 : i32
    %9 = tpu.memref_slice %arg1[%c4_i32_9, %c0_i32_10] : memref<8x32xf32, #tpu.memory_space<any>> -> memref<2x32xf32, #tpu.memory_space<any>>
    %10 = tpu.memref_slice %arg2[%c2_i32_7] : memref<4x!tpu.dma_semaphore, #tpu.memory_space<semaphore_mem>> -> memref<1x!tpu.dma_semaphore, #tpu.memory_space<semaphore_mem>>
    %11 = tpu.memref_squeeze %10 : memref<1x!tpu.dma_semaphore, #tpu.memory_space<semaphore_mem>> -> memref<!tpu.dma_semaphore, #tpu.memory_space<semaphore_mem>>
    tpu.enqueue_dma source(%8 : memref<2x32xf32, #tpu.memory_space<any>>) target(%9 : memref<2x32xf32, #tpu.memory_space<any>>) target_semaphore(%11 : memref<!tpu.dma_semaphore, #tpu.memory_space<semaphore_mem>>)
    %c3_i32 = arith.constant 3 : i32
    %c6_i32 = arith.constant 6 : i32
    %c0_i32_11 = arith.constant 0 : i32
    %12 = tpu.memref_slice %arg0[%c6_i32, %c0_i32_11] : memref<8x32xf32, #tpu.memory_space<any>> -> memref<2x32xf32, #tpu.memory_space<any>>
    %c6_i32_12 = arith.constant 6 : i32
    %c0_i32_13 = arith.constant 0 : i32
    %13 = tpu.memref_slice %arg1[%c6_i32_12, %c0_i32_13] : memref<8x32xf32, #tpu.memory_space<any>> -> memref<2x32xf32, #tpu.memory_space<any>>
    %14 = tpu.memref_slice %arg2[%c3_i32] : memref<4x!tpu.dma_semaphore, #tpu.memory_space<semaphore_mem>> -> memref<1x!tpu.dma_semaphore, #tpu.memory_space<semaphore_mem>>
    %15 = tpu.memref_squeeze %14 : memref<1x!tpu.dma_semaphore, #tpu.memory_space<semaphore_mem>> -> memref<!tpu.dma_semaphore, #tpu.memory_space<semaphore_mem>>
    tpu.enqueue_dma source(%12 : memref<2x32xf32, #tpu.memory_space<any>>) target(%13 : memref<2x32xf32, #tpu.memory_space<any>>) target_semaphore(%15 : memref<!tpu.dma_semaphore, #tpu.memory_space<semaphore_mem>>)
    %c0_i32_14 = arith.constant 0 : i32
    %c0_i32_15 = arith.constant 0 : i32
    %c0_i32_16 = arith.constant 0 : i32
    %16 = tpu.memref_slice %arg0[%c0_i32_15, %c0_i32_16] : memref<8x32xf32, #tpu.memory_space<any>> -> memref<2x32xf32, #tpu.memory_space<any>>
    %c0_i32_17 = arith.constant 0 : i32
    %c0_i32_18 = arith.constant 0 : i32
    %17 = tpu.memref_slice %arg1[%c0_i32_17, %c0_i32_18] : memref<8x32xf32, #tpu.memory_space<any>> -> memref<2x32xf32, #tpu.memory_space<any>>
    %18 = tpu.memref_slice %arg2[%c0_i32_14] : memref<4x!tpu.dma_semaphore, #tpu.memory_space<semaphore_mem>> -> memref<1x!tpu.dma_semaphore, #tpu.memory_space<semaphore_mem>>
    %19 = tpu.memref_squeeze %18 : memref<1x!tpu.dma_semaphore, #tpu.memory_space<semaphore_mem>> -> memref<!tpu.dma_semaphore, #tpu.memory_space<semaphore_mem>>
    tpu.wait_dma2 semaphore(%19 : memref<!tpu.dma_semaphore, #tpu.memory_space<semaphore_mem>>) src(%16 : memref<2x32xf32, #tpu.memory_space<any>>) dst(%17 : memref<2x32xf32, #tpu.memory_space<any>>)
    %c1_i32_19 = arith.constant 1 : i32
    %c2_i32_20 = arith.constant 2 : i32
    %c0_i32_21 = arith.constant 0 : i32
    %20 = tpu.memref_slice %arg0[%c2_i32_20, %c0_i32_21] : memref<8x32xf32, #tpu.memory_space<any>> -> memref<2x32xf32, #tpu.memory_space<any>>
    %c2_i32_22 = arith.constant 2 : i32
    %c0_i32_23 = arith.constant 0 : i32
    %21 = tpu.memref_slice %arg1[%c2_i32_22, %c0_i32_23] : memref<8x32xf32, #tpu.memory_space<any>> -> memref<2x32xf32, #tpu.memory_space<any>>
    %22 = tpu.memref_slice %arg2[%c1_i32_19] : memref<4x!tpu.dma_semaphore, #tpu.memory_space<semaphore_mem>> -> memref<1x!tpu.dma_semaphore, #tpu.memory_space<semaphore_mem>>
    %23 = tpu.memref_squeeze %22 : memref<1x!tpu.dma_semaphore, #tpu.memory_space<semaphore_mem>> -> memref<!tpu.dma_semaphore, #tpu.memory_space<semaphore_mem>>
    tpu.wait_dma2 semaphore(%23 : memref<!tpu.dma_semaphore, #tpu.memory_space<semaphore_mem>>) src(%20 : memref<2x32xf32, #tpu.memory_space<any>>) dst(%21 : memref<2x32xf32, #tpu.memory_space<any>>)
    %c2_i32_24 = arith.constant 2 : i32
    %c4_i32_25 = arith.constant 4 : i32
    %c0_i32_26 = arith.constant 0 : i32
    %24 = tpu.memref_slice %arg0[%c4_i32_25, %c0_i32_26] : memref<8x32xf32, #tpu.memory_space<any>> -> memref<2x32xf32, #tpu.memory_space<any>>
    %c4_i32_27 = arith.constant 4 : i32
    %c0_i32_28 = arith.constant 0 : i32
    %25 = tpu.memref_slice %arg1[%c4_i32_27, %c0_i32_28] : memref<8x32xf32, #tpu.memory_space<any>> -> memref<2x32xf32, #tpu.memory_space<any>>
    %26 = tpu.memref_slice %arg2[%c2_i32_24] : memref<4x!tpu.dma_semaphore, #tpu.memory_space<semaphore_mem>> -> memref<1x!tpu.dma_semaphore, #tpu.memory_space<semaphore_mem>>
    %27 = tpu.memref_squeeze %26 : memref<1x!tpu.dma_semaphore, #tpu.memory_space<semaphore_mem>> -> memref<!tpu.dma_semaphore, #tpu.memory_space<semaphore_mem>>
    tpu.wait_dma2 semaphore(%27 : memref<!tpu.dma_semaphore, #tpu.memory_space<semaphore_mem>>) src(%24 : memref<2x32xf32, #tpu.memory_space<any>>) dst(%25 : memref<2x32xf32, #tpu.memory_space<any>>)
    %c3_i32_29 = arith.constant 3 : i32
    %c6_i32_30 = arith.constant 6 : i32
    %c0_i32_31 = arith.constant 0 : i32
    %28 = tpu.memref_slice %arg0[%c6_i32_30, %c0_i32_31] : memref<8x32xf32, #tpu.memory_space<any>> -> memref<2x32xf32, #tpu.memory_space<any>>
    %c6_i32_32 = arith.constant 6 : i32
    %c0_i32_33 = arith.constant 0 : i32
    %29 = tpu.memref_slice %arg1[%c6_i32_32, %c0_i32_33] : memref<8x32xf32, #tpu.memory_space<any>> -> memref<2x32xf32, #tpu.memory_space<any>>
    %30 = tpu.memref_slice %arg2[%c3_i32_29] : memref<4x!tpu.dma_semaphore, #tpu.memory_space<semaphore_mem>> -> memref<1x!tpu.dma_semaphore, #tpu.memory_space<semaphore_mem>>
    %31 = tpu.memref_squeeze %30 : memref<1x!tpu.dma_semaphore, #tpu.memory_space<semaphore_mem>> -> memref<!tpu.dma_semaphore, #tpu.memory_space<semaphore_mem>>
    tpu.wait_dma2 semaphore(%31 : memref<!tpu.dma_semaphore, #tpu.memory_space<semaphore_mem>>) src(%28 : memref<2x32xf32, #tpu.memory_space<any>>) dst(%29 : memref<2x32xf32, #tpu.memory_space<any>>)
    return
  }
}

</mosaic_0001>

<bundles_post_ra>
// kernel: tpu_custom_call.1
= control target key start
LH: loop header
LB: loop body
LE: loop exit
PB: predicated region body
PF: predicated region fallthrough
CT: control target
= control target key end

     0   :  { %s116_s15 = smov [#allocation2]   ;;  %s117_s16 = smov [#allocation3]   ;;  %s163_s0 = inlined_call_operand.hbm [shape: f32[8,32], index: 0, kind: input, shape index: {}]   ;;  %s164_s1 = inlined_call_operand.hbm [shape: f32[8,32], index: 1, kind: output, shape index: {}]  }
   0x1   :  { %s10_s8 = sshll.u32 %s163_s0, 4  ;;  %s12_s11 = sshll.u32 %s164_s1, 4  ;;  %s11_s8 = int_to_ptr.hbm [resolvable:$true] %s10_s8  ;;  %s13_s11 = int_to_ptr.hbm [resolvable:$true] %s12_s11 }
   0x2   :  { %s17_s14 = scalar_lea.hbm %s163_s0, 2  ;;  %s118_s17 = smov 0  }
   0x3   :  { %16 = dma.general %s11_s8, 32, %s13_s11, %s116_s15, %s117_s16, [#allocation4], %s118_s17, 0  }
   0x4   :  { %s18_s20 = scalar_lea.hbm %s164_s1, 2  ;;  %s24_s21 = sshll.u32 %s17_s14, 4  ;;  %s25_s21 = int_to_ptr.hbm [resolvable:$true] %s24_s21 }
   0x5   :  { %s26_s22 = sshll.u32 %s18_s20, 4  ;;  %s31_s25 = scalar_lea.hbm %s163_s0, 4  ;;  %s27_s22 = int_to_ptr.hbm [resolvable:$true] %s26_s22 }
   0x6   :  { %s119_s26 = smov [#allocation2 + $0x1]   ;;  %s120_s27 = smov [#allocation5]  }
   0x7   :  { %30 = dma.general %s25_s21, 32, %s27_s22, %s119_s26, %s120_s27, [#allocation6], %s118_s17, 0  }
   0x8   :  { %s32_s30 = scalar_lea.hbm %s164_s1, 4  ;;  %s38_s2 = sshll.u32 %s31_s25, 4  ;;  %s39_s2 = int_to_ptr.hbm [resolvable:$true] %s38_s2 }
   0x9   :  { %s40_s3 = sshll.u32 %s32_s30, 4  ;;  %s45_s6 = scalar_lea.hbm %s163_s0, 6  ;;  %s41_s3 = int_to_ptr.hbm [resolvable:$true] %s40_s3 }
   0xa   :  { %s121_s7 = smov [#allocation2 + $0x2]   ;;  %s122_s8 = smov [#allocation7]  }
   0xb   :  { %44 = dma.general %s39_s2, 32, %s41_s3, %s121_s7, %s122_s8, [#allocation8], %s118_s17, 0  }
   0xc   :  { %s46_s11 = scalar_lea.hbm %s164_s1, 6  ;;  %s52_s12 = sshll.u32 %s45_s6, 4  ;;  %s53_s12 = int_to_ptr.hbm [resolvable:$true] %s52_s12 }
   0xd   :  { %s54_s13 = sshll.u32 %s46_s11, 4  ;;  %s123_s14 = smov [#allocation2 + $0x3]   ;;  %s55_s13 = int_to_ptr.hbm [resolvable:$true] %s54_s13 }
   0xe   :  { %s124_s15 = smov [#allocation9]  }
   0xf   :  { %58 = dma.general %s53_s12, 32, %s55_s13, %s123_s14, %s124_s15, [#allocation10], %s118_s17, 0  }
  0x10   :  { %108 = dma.done.wait [#allocation2], 32 }
  0x11   :  { %109 = vsyncadd [#allocation2], 4294967264 }
  0x12   :  { %110 = dma.done.wait [#allocation2 + $0x1], 32 }
  0x13   :  { %111 = vsyncadd [#allocation2 + $0x1], 4294967264 }
  0x14   :  { %112 = dma.done.wait [#allocation2 + $0x2], 32 }
  0x15   :  { %113 = vsyncadd [#allocation2 + $0x2], 4294967264 }
  0x16   :  { %114 = dma.done.wait [#allocation2 + $0x3], 32 }
  0x17   :  { %115 = vsyncadd [#allocation2 + $0x3], 4294967264 }
  0x18   :  { %68 = vsyncmov [#allocation2] }
  0x1b   :  { %s69_s0 = vpop.sfrf %68 }
  0x1c   :  { %p95_p0 = scmp.ne.s32.totalorder %s69_s0, 0 }
  0x1e   :  { %73 = shalt.err (%p95_p0)  }
  0x1f   :  { %75 = vsyncmov [#allocation2 + $0x1] }
  0x22   :  { %s76_s1 = vpop.sfrf %75 }
  0x23   :  { %p96_p1 = scmp.ne.s32.totalorder %s76_s1, 0 }
  0x25   :  { %80 = shalt.err (%p96_p1)  }
  0x26   :  { %82 = vsyncmov [#allocation2 + $0x2] }
  0x29   :  { %s83_s16 = vpop.sfrf %82 }
  0x2a   :  { %p97_p2 = scmp.ne.s32.totalorder %s83_s16, 0 }
  0x2c   :  { %87 = shalt.err (%p97_p2)  }
  0x2d   :  { %89 = vsyncmov [#allocation2 + $0x3] }
  0x30   :  { %s90_s17 = vpop.sfrf %89 }
  0x31   :  { %p98_p3 = scmp.ne.s32.totalorder %s90_s17, 0 }
  0x33   :  { %94 = shalt.err (%p98_p3)  }

</bundles_post_ra>
